<compile_context>
chip_gen: v6e
topology: v6e:2x2x1
jax: 0.10.0
libtpu: 0.0.40
codegen_flags: <defaults>
</compile_context>

<pallas_src>
import functools

import jax
import jax.numpy as jnp
from jax.experimental import pallas as pl
from jax.experimental.pallas import tpu as pltpu


def _round_up(x, m):
    return ((x + m - 1) // m) * m


def _choose_row_tile(n, requested):
    """Largest multiple-of-8 divisor of n <= requested, preferring a choice
    that leaves >= 2 tiles (keeps both v7x TensorCores busy).  Falls back to
    the full dimension, which is always a legal block."""
    cands = [c for c in range(8, min(requested, n) + 1, 8) if n % c == 0]
    for c in sorted(cands, reverse=True):
        if n // c >= 2:
            return c
    return max(cands) if cands else n


def _choose_seq_tile(s, tb, h, itemsize, budget):
    """Seq tile: a multiple of 128 dividing S (DMA/lane friendly) or the full
    axis; the largest one whose (tb, ts, H) hidden block fits the budget."""
    cands = sorted({c for c in (512, 256, 128) if c <= s and s % c == 0} | {s},
                   reverse=True)
    for c in cands:
        if tb * c * h * itemsize <= budget:
            return c
    return cands[-1]


# ----------------------------------------------------------------------------
# Kernel 1: encode()  ==  masked mean pool -> pooler Linear -> L2 normalize
# Grid: (batch tiles [parallel], seq tiles [arbitrary / reduction]).
# ----------------------------------------------------------------------------
def _encode_kernel(h_ref, m_ref, w_ref, b_ref, out_ref, sum_acc, cnt_acc):
    s_idx = pl.program_id(1)

    @pl.when(s_idx == 0)
    def _():
        sum_acc[...] = jnp.zeros_like(sum_acc)
        cnt_acc[...] = jnp.zeros_like(cnt_acc)

    h = h_ref[...]                       # (TB, TS, H)  storage dtype (bf16)
    m = m_ref[...]                       # (TB, TS, 1)  same dtype, exact 0/1
    # Masked multiply in the packed storage dtype (exact since m is 0/1),
    # accumulate in f32 scratch.
    sum_acc[...] += jnp.sum((h * m).astype(jnp.float32), axis=1)   # (TB, H)
    cnt_acc[...] += jnp.sum(m.astype(jnp.float32), axis=1)         # (TB, 1)

    @pl.when(s_idx == pl.num_programs(1) - 1)
    def _():
        # mean pool: approximate EUP reciprocal (free bundle slot).
        inv_cnt = pl.reciprocal(jnp.maximum(cnt_acc[...], 1e-9), approx=True)
        pooled = sum_acc[...] * inv_cnt                             # (TB, H)
        # pooler Linear: bf16 MXU operands, f32 accumulation.
        emb = jnp.dot(pooled.astype(jnp.bfloat16), w_ref[...],
                      preferred_element_type=jnp.float32) + b_ref[...]
        # L2 normalize via rsqrt (EUP).
        sumsq = jnp.sum(emb * emb, axis=1, keepdims=True)
        out_ref[...] = (emb * jax.lax.rsqrt(jnp.maximum(sumsq, 1e-24))
                        ).astype(out_ref.dtype)


def encode(last_hidden_state, attention_mask, pooler_w, pooler_b,
           *, tb=256, ts=None, block_budget_bytes=4 * 1024 * 1024,
           vmem_limit_bytes=32 * 1024 * 1024, out_dtype=jnp.bfloat16):
    """Masked mean pool -> pooler Linear -> L2 normalize in one pallas_call."""
    B, S, H = last_hidden_state.shape
    E = pooler_w.shape[1]
    h_dtype = last_hidden_state.dtype
    itemsize = jnp.dtype(h_dtype).itemsize

    # Tile choice from the VMEM budget (no batch padding: tb divides B or ==B).
    tb = _choose_row_tile(B, tb)
    if ts is None or not (ts == S or (S % ts == 0 and ts % 128 == 0)):
        ts = _choose_seq_tile(S, tb, H, itemsize, block_budget_bytes)
    while tb > 8 and tb * ts * H * itemsize > block_budget_bytes:
        new_tb = _choose_row_tile(B, max(8, tb // 2))
        if new_tb >= tb:
            break
        tb = new_tb
        ts = _choose_seq_tile(S, tb, H, itemsize, block_budget_bytes)

    # Mask kept (B, S, 1) so the in-kernel expand is a free lane-broadcast
    # (a (B, S) block would need an unsupported sublane relayout in-kernel);
    # stored in the hidden dtype (bf16) to halve its VMEM / DMA footprint.
    mask3 = attention_mask.astype(h_dtype).reshape(B, S, 1)
    w_cast = pooler_w.astype(jnp.bfloat16)        # tiny; native MXU dtype
    b2 = pooler_b.astype(jnp.float32).reshape(1, E)

    grid = (B // tb, S // ts)
    bytes_acc = (last_hidden_state.size * itemsize + mask3.size * itemsize
                 + w_cast.size * 2 + B * E * jnp.dtype(out_dtype).itemsize)
    cost = pl.CostEstimate(flops=int(2 * B * S * H + 2 * B * H * E),
                           transcendentals=int(2 * B),
                           bytes_accessed=int(bytes_acc))

    return pl.pallas_call(
        _encode_kernel,
        out_shape=jax.ShapeDtypeStruct((B, E), out_dtype),
        grid=grid,
        in_specs=[
            pl.BlockSpec((tb, ts, H), lambda i, s: (i, s, 0)),
            pl.BlockSpec((tb, ts, 1), lambda i, s: (i, s, 0)),
            pl.BlockSpec((H, E), lambda i, s: (0, 0)),
            pl.BlockSpec((1, E), lambda i, s: (0, 0)),
        ],
        out_specs=pl.BlockSpec((tb, E), lambda i, s: (i, 0)),
        scratch_shapes=[pltpu.VMEM((tb, H), jnp.float32),
                        pltpu.VMEM((tb, 1), jnp.float32)],
        compiler_params=pltpu.CompilerParams(
            dimension_semantics=("parallel", "arbitrary"),
            vmem_limit_bytes=vmem_limit_bytes),
        cost_estimate=cost,
    )(last_hidden_state, mask3, w_cast, b2)


# ----------------------------------------------------------------------------
# Kernel 2: contrastive scores q @ d^T / temperature  +  per-query logsumexp.
# Grid: (query-row tiles [parallel], doc-column tiles [arbitrary]).
# Label-logit gather and the mean CE reduction happen in a tiny JAX epilogue.
# ----------------------------------------------------------------------------
def _score_lse_kernel(q_ref, d_ref, scores_ref, lse_ref, m_acc, l_acc,
                      *, inv_temp, valid_cols):
    j = pl.program_id(1)

    @pl.when(j == 0)
    def _():
        m_acc[...] = jnp.full_like(m_acc, -jnp.inf)
        l_acc[...] = jnp.zeros_like(l_acc)

    # bf16 MXU operands straight from HBM; contract dim 1 of both (no d.T);
    # 1/temperature applied once to the f32 result tile (q never rescaled).
    s = jax.lax.dot_general(q_ref[...], d_ref[...], (((1,), (1,)), ((), ())),
                            preferred_element_type=jnp.float32) * inv_temp
    scores_ref[...] = s

    if valid_cols is not None:        # static: only emitted when Nd was padded
        tq, td = s.shape
        col = jax.lax.broadcasted_iota(jnp.int32, (tq, td), 1) + j * td
        s = jnp.where(col < valid_cols, s, -jnp.inf)

    # Online logsumexp across doc tiles.
    m_new = jnp.maximum(m_acc[...], jnp.max(s, axis=1, keepdims=True))
    l_acc[...] = (jnp.exp(m_acc[...] - m_new) * l_acc[...]
                  + jnp.sum(jnp.exp(s - m_new), axis=1, keepdims=True))
    m_acc[...] = m_new

    @pl.when(j == pl.num_programs(1) - 1)
    def _():
        lse_ref[...] = m_acc[...] + jnp.log(l_acc[...])


def contrastive_scores_and_loss(q_emb, d_emb, temperature=1.0, loss_scale=1.0,
                                *, tq=512, td=256,
                                vmem_limit_bytes=32 * 1024 * 1024):
    nq, e = q_emb.shape
    nd, e2 = d_emb.shape
    assert e == e2
    assert nd % nq == 0, "in-batch label construction assumes Nd % Nq == 0"
    group = nd // nq

    q = q_emb.astype(jnp.bfloat16)
    d = d_emb.astype(jnp.bfloat16)

    # Lane-dense doc axis: pad Nd to a multiple of 128 (no full-axis fallback
    # block); 256-wide doc tile when possible (fills the v6e/v7x 256x256 MXU).
    nd_pad = _round_up(nd, 128)
    if td % 128 != 0:
        td = 256
    td = min(td, nd_pad)
    if nd_pad % td != 0:
        td = 128
    if nd_pad != nd:
        d = jnp.pad(d, ((0, nd_pad - nd), (0, 0)))

    tq = _choose_row_tile(nq, tq)

    grid = (nq // tq, nd_pad // td)
    cost = pl.CostEstimate(
        flops=int(2 * nq * nd_pad * e + 4 * nq * nd_pad),
        transcendentals=int(nq * nd_pad),
        bytes_accessed=int((nq + (nq // tq) * nd_pad) * e * 2
                           + nq * nd_pad * 4 + nq * 4))

    scores, lse = pl.pallas_call(
        functools.partial(_score_lse_kernel,
                          inv_temp=float(1.0 / temperature),
                          valid_cols=(nd if nd_pad != nd else None)),
        out_shape=(jax.ShapeDtypeStruct((nq, nd_pad), jnp.float32),
                   jax.ShapeDtypeStruct((nq, 1), jnp.float32)),
        grid=grid,
        in_specs=[
            pl.BlockSpec((tq, e), lambda i, j: (i, 0)),
            pl.BlockSpec((td, e), lambda i, j: (j, 0)),
        ],
        out_specs=(
            pl.BlockSpec((tq, td), lambda i, j: (i, j)),
            pl.BlockSpec((tq, 1), lambda i, j: (i, 0)),
        ),
        scratch_shapes=[pltpu.VMEM((tq, 1), jnp.float32),
                        pltpu.VMEM((tq, 1), jnp.float32)],
        compiler_params=pltpu.CompilerParams(
            dimension_semantics=("parallel", "arbitrary"),
            vmem_limit_bytes=vmem_limit_bytes),
        cost_estimate=cost,
    )(q, d)

    if nd_pad != nd:
        scores = scores[:, :nd]

    # Tiny O(Nq) epilogue: gather label logits from the scores already written
    # to HBM; CE(mean) = mean(logsumexp - label_logit) * loss_scale.
    labels = jnp.arange(nq) * group
    label_logits = scores[jnp.arange(nq), labels]
    loss = jnp.mean(lse[:, 0] - label_logits) * loss_scale
    return scores, loss


# ----------------------------------------------------------------------------
# Module-level wrapper (mirrors AutoModelForSentenceEmbedding.forward with
# pooling='mean', normalize=True, add_pooler=True).
# ----------------------------------------------------------------------------
def sentence_embedding_forward(query_hidden, query_mask, doc_hidden, doc_mask,
                               pooler_w, pooler_b,
                               temperature=1.0, loss_scale=1.0):
    # Two independent encode() calls -- no concat / pad of the big activation
    # tensors (that wrapper copy was the largest avoidable HBM cost).
    q_reps = encode(query_hidden, query_mask, pooler_w, pooler_b)
    d_reps = encode(doc_hidden, doc_mask, pooler_w, pooler_b)

    # TODO(synk): negatives_x_device (torch.distributed all-gather) and the
    # exact full_contrastive_scores_and_labels(use_all_pairs=True) extra
    # q@qT / d@qT blocks are not reproducible; standard in-batch q@dT variant.
    scores, loss = contrastive_scores_and_loss(q_reps, d_reps,
                                               temperature, loss_scale)
    return {"q_reps": q_reps, "d_reps": d_reps, "scores": scores, "loss": loss}


# ----------------------------------------------------------------------------
# Pure-JAX references for correctness checks.
# ----------------------------------------------------------------------------
def _ref_encode(h, mask, w, b):
    h = h.astype(jnp.float32)
    m = mask.astype(jnp.float32)
    pooled = (h * m[:, :, None]).sum(1) / jnp.maximum(m.sum(1), 1e-9)[:, None]
    emb = jnp.dot(pooled.astype(jnp.bfloat16), w.astype(jnp.bfloat16),
                  preferred_element_type=jnp.float32) + b.astype(jnp.float32)
    norm = jnp.linalg.norm(emb, axis=1, keepdims=True)
    return emb / jnp.maximum(norm, 1e-12)


def _ref_scores_loss(q, d, temperature, loss_scale):
    s = jax.lax.dot_general(q.astype(jnp.bfloat16), d.astype(jnp.bfloat16),
                            (((1,), (1,)), ((), ())),
                            preferred_element_type=jnp.float32) / temperature
    nq, nd = s.shape
    labels = jnp.arange(nq) * (nd // nq)
    logp = jax.nn.log_softmax(s, axis=-1)
    loss = -jnp.mean(logp[jnp.arange(nq), labels]) * loss_scale
    return s, loss


if __name__ == "__main__":
    # Small but tiling-exercising shapes:
    #   Nq=8 queries, Nd=256 docs (group=32), seq=16, hidden=32, emb_dim=32.
    # Backbone activations in bf16 (storage/DMA dtype); pooler params in f32.
    Nq, Nd, S, H, E = 8, 256, 16, 32, 32
    key = jax.random.PRNGKey(0)
    k1, k2, k3, k4, k5, k6 = jax.random.split(key, 6)

    query_hidden = jax.random.normal(k1, (Nq, S, H),
                                     dtype=jnp.float32).astype(jnp.bfloat16)
    doc_hidden = jax.random.normal(k2, (Nd, S, H),
                                   dtype=jnp.float32).astype(jnp.bfloat16)

    q_lens = jax.random.randint(k5, (Nq,), 3, S + 1)
    d_lens = jax.random.randint(k6, (Nd,), 3, S + 1)
    query_mask = (jnp.arange(S)[None, :] < q_lens[:, None]).astype(jnp.int32)
    doc_mask = (jnp.arange(S)[None, :] < d_lens[:, None]).astype(jnp.int32)

    pooler_w = jax.random.normal(k3, (H, E), dtype=jnp.float32) * 0.05
    pooler_b = jax.random.normal(k4, (E,), dtype=jnp.float32) * 0.01

    temperature, loss_scale = 0.05, 1.0
    out = sentence_embedding_forward(query_hidden, query_mask,
                                     doc_hidden, doc_mask,
                                     pooler_w, pooler_b,
                                     temperature=temperature,
                                     loss_scale=loss_scale)
    jax.block_until_ready(out)

    # --- correctness: encode kernel vs pure-JAX reference ---
    ref_q = _ref_encode(query_hidden, query_mask, pooler_w, pooler_b)
    ref_d = _ref_encode(doc_hidden, doc_mask, pooler_w, pooler_b)
    assert jnp.allclose(out["q_reps"].astype(jnp.float32), ref_q,
                        atol=1e-2, rtol=1e-2), "q_reps mismatch"
    assert jnp.allclose(out["d_reps"].astype(jnp.float32), ref_d,
                        atol=1e-2, rtol=1e-2), "d_reps mismatch"

    # --- correctness: score/loss kernel vs reference on the same embeddings ---
    ref_scores, ref_loss = _ref_scores_loss(out["q_reps"], out["d_reps"],
                                            temperature, loss_scale)
    assert jnp.allclose(out["scores"], ref_scores, atol=1e-2, rtol=1e-3), \
        "scores mismatch"
    assert jnp.allclose(out["loss"], ref_loss, atol=1e-2, rtol=1e-3), \
        "loss mismatch"

    print("KERNEL_OK")
</pallas_src>

<mosaic_0001>
module attributes {stable_mosaic.version = 11 : i64} {
  func.func @_encode_kernel(%arg0: i32, %arg1: i32, %arg2: memref<8x16x32xbf16, #tpu.memory_space<vmem>>, %arg3: memref<8x16x1xbf16, #tpu.memory_space<vmem>>, %arg4: memref<32x32xbf16, #tpu.memory_space<vmem>>, %arg5: memref<1x32xf32, #tpu.memory_space<vmem>>, %arg6: memref<8x32xbf16, #tpu.memory_space<vmem>>, %arg7: memref<8x32xf32, #tpu.memory_space<vmem>>, %arg8: memref<8x1xf32, #tpu.memory_space<vmem>>) attributes {dimension_semantics = [#tpu.dimension_semantics<parallel>, #tpu.dimension_semantics<arbitrary>], iteration_bounds = array<i64: 1, 1>, scalar_prefetch = 0 : i64, scratch_operands = 2 : i64, tpu.core_type = #tpu.core_type<tc>, window_params = [{transform_indices = @transform_0, window_bounds = array<i64: 8, 16, 32>}, {transform_indices = @transform_1, window_bounds = array<i64: 8, 16, 1>}, {pipeline_mode = #tpu.pipeline_mode<synchronous>, transform_indices = @transform_2, window_bounds = array<i64: 32, 32>}, {pipeline_mode = #tpu.pipeline_mode<synchronous>, transform_indices = @transform_3, window_bounds = array<i64: 1, 32>}, {transform_indices = @transform_4, window_bounds = array<i64: 8, 32>}]} {
    %c0_i32 = arith.constant 0 : i32
    %0 = arith.cmpi eq, %arg1, %c0_i32 : i32
    %1 = arith.extui %0 : i1 to i32
    %c0_i32_0 = arith.constant 0 : i32
    %2 = arith.cmpi ne, %1, %c0_i32_0 : i32
    scf.if %2 {
      %cst_17 = arith.constant 0.000000e+00 : f32
      %20 = vector.broadcast %cst_17 : f32 to vector<8x32xf32>
      %c0_18 = arith.constant 0 : index
      %c0_19 = arith.constant 0 : index
      %21 = vector.load %arg7[%c0_18, %c0_19] : memref<8x32xf32, #tpu.memory_space<vmem>>, vector<8x32xf32>
      tpu.vector_store %arg7[%c0_18, %c0_19], %20 {strides = array<i32>} : memref<8x32xf32, #tpu.memory_space<vmem>>, vector<8x32xf32>,
      %cst_20 = arith.constant 0.000000e+00 : f32
      %22 = vector.broadcast %cst_20 : f32 to vector<8x1xf32>
      %c0_21 = arith.constant 0 : index
      %c0_22 = arith.constant 0 : index
      %23 = vector.load %arg8[%c0_21, %c0_22] : memref<8x1xf32, #tpu.memory_space<vmem>>, vector<8x1xf32>
      tpu.vector_store %arg8[%c0_21, %c0_22], %22 {strides = array<i32>} : memref<8x1xf32, #tpu.memory_space<vmem>>, vector<8x1xf32>,
    } else {
    }
    %c0 = arith.constant 0 : index
    %c0_1 = arith.constant 0 : index
    %c0_2 = arith.constant 0 : index
    %3 = vector.load %arg2[%c0, %c0_1, %c0_2] : memref<8x16x32xbf16, #tpu.memory_space<vmem>>, vector<8x16x32xbf16>
    %c0_3 = arith.constant 0 : index
    %c0_4 = arith.constant 0 : index
    %c0_5 = arith.constant 0 : index
    %4 = vector.load %arg3[%c0_3, %c0_4, %c0_5] : memref<8x16x1xbf16, #tpu.memory_space<vmem>>, vector<8x16x1xbf16>
    %c0_6 = arith.constant 0 : index
    %c0_7 = arith.constant 0 : index
    %5 = vector.load %arg7[%c0_6, %c0_7] : memref<8x32xf32, #tpu.memory_space<vmem>>, vector<8x32xf32>
    %6 = vector.broadcast %4 : vector<8x16x1xbf16> to vector<8x16x32xbf16>
    %7 = arith.mulf %3, %6 : vector<8x16x32xbf16>
    %8 = arith.extf %7 : vector<8x16x32xbf16> to vector<8x16x32xf32>
    %cst = arith.constant dense<0.000000e+00> : vector<8x32xf32>
    %9 = vector.multi_reduction <add>, %8, %cst [1] : vector<8x16x32xf32> to vector<8x32xf32>
    %10 = arith.addf %5, %9 : vector<8x32xf32>
    %c0_8 = arith.constant 0 : index
    %c0_9 = arith.constant 0 : index
    %11 = vector.load %arg7[%c0_8, %c0_9] : memref<8x32xf32, #tpu.memory_space<vmem>>, vector<8x32xf32>
    tpu.vector_store %arg7[%c0_8, %c0_9], %10 {strides = array<i32>} : memref<8x32xf32, #tpu.memory_space<vmem>>, vector<8x32xf32>,
    %c0_10 = arith.constant 0 : index
    %c0_11 = arith.constant 0 : index
    %12 = vector.load %arg8[%c0_10, %c0_11] : memref<8x1xf32, #tpu.memory_space<vmem>>, vector<8x1xf32>
    %13 = arith.extf %4 : vector<8x16x1xbf16> to vector<8x16x1xf32>
    %cst_12 = arith.constant dense<0.000000e+00> : vector<8x1xf32>
    %14 = vector.multi_reduction <add>, %13, %cst_12 [1] : vector<8x16x1xf32> to vector<8x1xf32>
    %15 = arith.addf %12, %14 : vector<8x1xf32>
    %c0_13 = arith.constant 0 : index
    %c0_14 = arith.constant 0 : index
    %16 = vector.load %arg8[%c0_13, %c0_14] : memref<8x1xf32, #tpu.memory_space<vmem>>, vector<8x1xf32>
    tpu.vector_store %arg8[%c0_13, %c0_14], %15 {strides = array<i32>} : memref<8x1xf32, #tpu.memory_space<vmem>>, vector<8x1xf32>,
    %c0_i32_15 = arith.constant 0 : i32
    %17 = arith.cmpi eq, %arg1, %c0_i32_15 : i32
    %18 = arith.extui %17 : i1 to i32
    %c0_i32_16 = arith.constant 0 : i32
    %19 = arith.cmpi ne, %18, %c0_i32_16 : i32
    scf.if %19 {
      %c0_17 = arith.constant 0 : index
      %c0_18 = arith.constant 0 : index
      %20 = vector.load %arg8[%c0_17, %c0_18] : memref<8x1xf32, #tpu.memory_space<vmem>>, vector<8x1xf32>
      %cst_19 = arith.constant 9.99999971E-10 : f32
      %21 = vector.broadcast %cst_19 : f32 to vector<8x1xf32>
      %22 = arith.maximumf %20, %21 : vector<8x1xf32>
      %23 = tpu.reciprocal %22 {approx = true} : vector<8x1xf32> -> vector<8x1xf32>
      %c0_20 = arith.constant 0 : index
      %c0_21 = arith.constant 0 : index
      %24 = vector.load %arg7[%c0_20, %c0_21] : memref<8x32xf32, #tpu.memory_space<vmem>>, vector<8x32xf32>
      %25 = vector.broadcast %23 : vector<8x1xf32> to vector<8x32xf32>
      %26 = arith.mulf %24, %25 : vector<8x32xf32>
      %27 = arith.truncf %26 : vector<8x32xf32> to vector<8x32xbf16>
      %c0_22 = arith.constant 0 : index
      %c0_23 = arith.constant 0 : index
      %28 = vector.load %arg4[%c0_22, %c0_23] : memref<32x32xbf16, #tpu.memory_space<vmem>>, vector<32x32xbf16>
      %cst_24 = arith.constant dense<0.000000e+00> : vector<8x32xf32>
      %29 = tpu.matmul %27, %28, %cst_24 {dimension_numbers = #tpu.dot_dimension_numbers<[1], [0], [0], [1], [0, 0, 1, 1], [], []>} : vector<8x32xbf16>, vector<32x32xbf16>, vector<8x32xf32> -> vector<8x32xf32>
      %c0_25 = arith.constant 0 : index
      %c0_26 = arith.constant 0 : index
      %30 = vector.load %arg5[%c0_25, %c0_26] : memref<1x32xf32, #tpu.memory_space<vmem>>, vector<1x32xf32>
      %31 = vector.broadcast %30 : vector<1x32xf32> to vector<8x32xf32>
      %32 = arith.addf %29, %31 : vector<8x32xf32>
      %33 = arith.mulf %32, %32 : vector<8x32xf32>
      %cst_27 = arith.constant dense<0.000000e+00> : vector<8xf32>
      %34 = vector.multi_reduction <add>, %33, %cst_27 [1] : vector<8x32xf32> to vector<8xf32>
      %35 = vector.shape_cast %34 : vector<8xf32> to vector<8x1xf32>
      %cst_28 = arith.constant 1.000000e-24 : f32
      %36 = vector.broadcast %cst_28 : f32 to vector<8x1xf32>
      %37 = arith.maximumf %35, %36 : vector<8x1xf32>
      %38 = math.rsqrt %37 : vector<8x1xf32>
      %39 = vector.broadcast %38 : vector<8x1xf32> to vector<8x32xf32>
      %40 = arith.mulf %32, %39 : vector<8x32xf32>
      %41 = arith.truncf %40 : vector<8x32xf32> to vector<8x32xbf16>
      %c0_29 = arith.constant 0 : index
      %c0_30 = arith.constant 0 : index
      %42 = vector.load %arg6[%c0_29, %c0_30] : memref<8x32xbf16, #tpu.memory_space<vmem>>, vector<8x32xbf16>
      tpu.vector_store %arg6[%c0_29, %c0_30], %41 {strides = array<i32>} : memref<8x32xbf16, #tpu.memory_space<vmem>>, vector<8x32xbf16>,
    } else {
    }
    return
  }
  func.func @transform_0(%arg0: i32, %arg1: i32) -> (i32, i32, i32) {
    %c0_i32 = arith.constant 0 : i32
    %c0_i32_0 = arith.constant 0 : i32
    return %arg0, %arg1, %c0_i32 : i32, i32, i32
  }
  func.func @transform_1(%arg0: i32, %arg1: i32) -> (i32, i32, i32) {
    %c0_i32 = arith.constant 0 : i32
    %c0_i32_0 = arith.constant 0 : i32
    return %arg0, %arg1, %c0_i32 : i32, i32, i32
  }
  func.func @transform_2(%arg0: i32, %arg1: i32) -> (i32, i32) {
    %c0_i32 = arith.constant 0 : i32
    %c0_i32_0 = arith.constant 0 : i32
    %c0_i32_1 = arith.constant 0 : i32
    return %c0_i32, %c0_i32_0 : i32, i32
  }
  func.func @transform_3(%arg0: i32, %arg1: i32) -> (i32, i32) {
    %c0_i32 = arith.constant 0 : i32
    %c0_i32_0 = arith.constant 0 : i32
    %c0_i32_1 = arith.constant 0 : i32
    return %c0_i32, %c0_i32_0 : i32, i32
  }
  func.func @transform_4(%arg0: i32, %arg1: i32) -> (i32, i32) {
    %c0_i32 = arith.constant 0 : i32
    %c0_i32_0 = arith.constant 0 : i32
    return %arg0, %c0_i32 : i32, i32
  }
}

</mosaic_0001>

<bundles_post_ra>
// kernel: tpu_custom_call.1
= control target key start
LH: loop header
LB: loop body
LE: loop exit
PB: predicated region body
PF: predicated region fallthrough
CT: control target
= control target key end

     0   :  { %9 = vsyncpa [#allocation5], 0  ;;  %s925_s0 = inlined_call_operand.vmem [shape: bf16[8,16,32], index: 0, kind: input, shape index: {}]   ;;  %s926_s1 = inlined_call_operand.vmem [shape: bf16[8,16,1], index: 1, kind: input, shape index: {}]   ;;  %s927_s2 = inlined_call_operand.hbm [shape: bf16[32,32], index: 2, kind: input, shape index: {}]   ;;  %s928_s3 = inlined_call_operand.vmem [shape: f32[1,32], index: 3, kind: input, shape index: {}]   ;;  %s929_s4 = inlined_call_operand.hbm [shape: bf16[8,32], index: 4, kind: output, shape index: {}]  }
   0x1   :  { %10 = vsyncpa [#allocation6], 0  ;;  %s684_s15 = smov [#allocation4]  }
   0x2   :  { %s20_s16 = sshll.u32 %s684_s15, 4  ;;  %s21_s16 = int_to_ptr.vmem [resolvable:$true] %s20_s16 }
   0x3   :  { %s648_s17 = scalar_lea.vmem %s21_s16, 256  ;;  %p653_p1 = scmp.lt.s32.totalorder %s21_s16, %s21_s16 }
   0x4   :  { %p649_p0 = scmp.ne.s32.totalorder %s21_s16, %s648_s17  ;;  %p654_p2 = scmp.lt.s32.totalorder %s648_s17, %s648_s17 }
   0x6   :  { %p655_p3 = por %p654_p2, %p653_p1 }
   0x8   :  { %p656_p4 = pnand %p655_p3, %p649_p0 }
   0xa   :  { %659 = shalt.err (!%p656_p4)
}
   0xb   :  { %s685_s18 = smov 64   ;;  %s686_s19 = smov 4  }
   0xc   :  { %26 = dma.hbm_to_vmem [thread:$0]  %s927_s2, 256, %s21_s16, [#allocation5], %s685_s18, %s685_s18, %s686_s19  }
   0xd   :  { %680 = dma.done.wait [#allocation5], 256  }
   0xe   :  { %681 = vsyncadd [#allocation5], 4294967040  ;;  %v687_v0 = vmov 0   ;;  %vm39_vm0 = vcmask 7168   ;;  %vm37_vm1 = vcmask 261120   ;;  %v688_v1 = vmov 0.0  }
   0xf   :  { %633 = vset.pattern.permute.xlu1 %v687_v0  ;;  %632 = vset.pattern.permute.xlu0 %v687_v0  ;;  %40 = vst.msk [vmem:[#allocation3] sm:$0xff] %vm39_vm0, %v688_v1  ;;  %v59_v2 = vld [vmem:[%s926_s1 + $0x8] sm:$0xf]  ;;  %v57_v3 = vld [vmem:[%s926_s1] sm:$0xf]  ;;  %vm379_vm2 = vcmask 1041409  }
  0x10   :  { %38 = vst.msk [vmem:[#allocation2] sm:$0xff] %vm37_vm1, %v688_v1  ;;  %616 = vmatprep.subr.bf16.mxu0 %v688_v1  ;;  %v60_v4 = vld [vmem:[%s926_s1 + $0xc] sm:$0xf]  ;;  %100 = vperm.xlu1 %633, %v59_v2   ;;  %v399_v5 = vunpack.c.l.bf16 %v59_v2  ;;  %v397_v6 = vunpack.c.l.bf16 %v57_v3  ;;  %v58_v8 = vld [vmem:[%s926_s1 + $0x4] sm:$0xf]  ;;  %vm381_vm3 = vcmask 1042434  }
  0x11   :  { %76 = vperm.xlu0 %632, %v57_v3   ;;  %v400_v7 = vunpack.c.l.bf16 %v60_v4  ;;  %v62_v9 = vld [vmem:[%s926_s1 + $0x14] sm:$0xf]  ;;  %v61_v10 = vld [vmem:[%s926_s1 + $0x10] sm:$0xf]  ;;  %v398_v11 = vunpack.c.l.bf16 %v58_v8  ;;  %v64_v14 = vld [vmem:[%s926_s1 + $0x1c] sm:$0xf] }
  0x12   :  { %v402_v12 = vunpack.c.l.bf16 %v62_v9  ;;  %v401_v13 = vunpack.c.l.bf16 %v61_v10  ;;  %v63_v15 = vld [vmem:[%s926_s1 + $0x18] sm:$0xf]  ;;  %v752_v16 = vld [vmem:[%s926_s1 + $0x24] sm:$0xf]  ;;  %v423_v17 = vsel %vm39_vm0, %v399_v5, 0.0  ;;  %v414_v18 = vsel %vm39_vm0, %v397_v6, 0.0 }
  0x13   :  { %v424_v19 = vsel %vm39_vm0, %v400_v7, 0.0  ;;  %v404_v20 = vunpack.c.l.bf16 %v64_v14  ;;  %v760_v21 = vld [vmem:[%s926_s1 + $0x20] sm:$0xf]  ;;  %v415_v23 = vsel %vm39_vm0, %v398_v11, 0.0  ;;  %v768_v26 = vld [vmem:[%s926_s1 + $0x2c] sm:$0xf]  ;;  %v403_v30 = vunpack.c.l.bf16 %v63_v15 }
  0x14   :  { %v425_v22 = vadd.f32 %v424_v19, %v423_v17  ;;  %v433_v24 = vsel %vm39_vm0, %v402_v12, 0.0  ;;  %v432_v25 = vsel %vm39_vm0, %v401_v13, 0.0  ;;  %112 = vperm.xlu1 %633, %v60_v4   ;;  %v416_v27 = vadd.f32 %v415_v23, %v414_v18  ;;  %v774_v31 = vld [vmem:[%s926_s1 + $0x28] sm:$0xf]  ;;  %v784_v40 = vld [vmem:[%s926_s1 + $0x34] sm:$0xf] }
  0x15   :  { %88 = vperm.xlu0 %632, %v58_v8   ;;  %v434_v28 = vadd.f32 %v433_v24, %v432_v25  ;;  %v442_v29 = vsel %vm39_vm0, %v404_v20, 0.0  ;;  %v406_v33 = vunpack.c.l.bf16 %v752_v16  ;;  %v405_v34 = vunpack.c.l.bf16 %v760_v21  ;;  %v791_v45 = vld [vmem:[%s926_s1 + $0x30] sm:$0xf]  ;;  %v797_v50 = vld [vmem:[%s926_s1 + $0x3c] sm:$0xf]  ;;  %s691_s30 = smov [#allocation7]  }
  0x16   :  { %v426_v32 = vrot.slane %v425_v22, 4  ;;  %v408_v35 = vunpack.c.l.bf16 %v768_v26  ;;  %v417_v36 = vrot.slane %v416_v27, 4  ;;  %v441_v38 = vsel %vm39_vm0, %v403_v30, 0.0  ;;  %v71_v12 = vld [vmem:[%s926_s1 + $0x38] sm:$0xf]  ;;  %s600_s5 = sshll.u32 %s691_s30, 4  ;;  %s601_s5 = int_to_ptr.vmem [resolvable:$true] %s600_s5 }
  0x17   :  { %v435_v37 = vrot.slane %v434_v28, 4  ;;  %v407_v39 = vunpack.c.l.bf16 %v774_v31  ;;  %v443_v42 = vadd.f32 %v442_v29, %v441_v38  ;;  %v451_v43 = vsel %vm39_vm0, %v406_v33, 0.0  ;;  %p665_p6 = scmp.lt.s32.totalorder %s601_s5, %s601_s5 }
  0x18   :  { %v427_v41 = vadd.f32 %v426_v32, %v425_v22  ;;  %v450_v44 = vsel %vm39_vm0, %v405_v34, 0.0  ;;  %v418_v46 = vadd.f32 %v417_v36, %v416_v27  ;;  %136 = vperm.xlu1 %633, %v62_v9   ;;  %v460_v49 = vsel %vm39_vm0, %v408_v35, 0.0 }
  0x19   :  { %v436_v47 = vadd.f32 %v435_v37, %v434_v28  ;;  %124 = vperm.xlu0 %632, %v61_v10   ;;  %v452_v48 = vadd.f32 %v451_v43, %v450_v44  ;;  %v444_v52 = vrot.slane %v443_v42, 4  ;;  %v459_v53 = vsel %vm39_vm0, %v407_v39, 0.0 }
  0x1a   :  { %v428_v51 = vrot.slane %v427_v41, 2  ;;  %v410_v54 = vunpack.c.l.bf16 %v784_v40  ;;  %v419_v55 = vrot.slane %v418_v46, 2  ;;  %v461_v58 = vadd.f32 %v460_v49, %v459_v53 }
  0x1b   :  { %v437_v56 = vrot.slane %v436_v47, 2  ;;  %v453_v57 = vrot.slane %v452_v48, 4  ;;  %v445_v60 = vadd.f32 %v444_v52, %v443_v42  ;;  %v409_v62 = vunpack.c.l.bf16 %v791_v45 }
  0x1c   :  { %v429_v59 = vadd.f32 %v428_v51, %v427_v41  ;;  %v469_v61 = vsel %vm39_vm0, %v410_v54, 0.0  ;;  %v420_v63 = vadd.f32 %v419_v55, %v418_v46  ;;  %160 = vperm.xlu1 %633, %v64_v14   ;;  %v462_v3 = vrot.slane %v461_v58, 4  ;;  %v634_v55 = vld [vmem:[#allocation4 + $0x8] sm:$0xff]  }
  0x1d   :  { %v438_v0 = vadd.f32 %v437_v56, %v436_v47  ;;  %148 = vperm.xlu0 %632, %v63_v15   ;;  %v454_v2 = vadd.f32 %v453_v57, %v452_v48  ;;  %v446_v5 = vrot.slane %v445_v60, 2  ;;  %v468_v6 = vsel %vm39_vm0, %v409_v62, 0.0  ;;  %617 = vmatpush3.bf16.msra.mxu0 %v634_v55 }
  0x1e   :  { %v430_v4 = vrot.slane %v429_v59, 1  ;;  %v412_v7 = vunpack.c.l.bf16 %v797_v50  ;;  %v421_v8 = vrot.slane %v420_v63, 1  ;;  %v463_v11 = vadd.f32 %v462_v3, %v461_v58  ;;  %618 = vmatprep.subr.bf16.mxu0 %v688_v1 }
  0x1f   :  { %v439_v9 = vrot.slane %v438_v0, 1  ;;  %v455_v10 = vrot.slane %v454_v2, 2  ;;  %v447_v14 = vadd.f32 %v446_v5, %v445_v60  ;;  %v470_v15 = vadd.f32 %v469_v61, %v468_v6 }
  0x20   :  { %v431_v13 = vadd.f32 %v430_v4, %v429_v59  ;;  %v422_v17 = vadd.f32 %v421_v8, %v420_v63  ;;  %184 = vperm.xlu1 %633, %v752_v16   ;;  %v464_v20 = vrot.slane %v463_v11, 2  ;;  %v478_v24 = vsel %vm39_vm0, %v412_v7, 0.0  ;;  %v44_v7 = vld [vmem:[%s925_s0 + $0xc] sm:$0xf] }
  0x21   :  { %v440_v18 = vadd.f32 %v439_v9, %v438_v0  ;;  %v456_v19 = vadd.f32 %v455_v10, %v454_v2  ;;  %172 = vperm.xlu0 %632, %v760_v21   ;;  %v448_v22 = vrot.slane %v447_v14, 1  ;;  %v471_v23 = vrot.slane %v470_v15, 4  ;;  %v43_v2 = vld [vmem:[%s925_s0 + $0x8] sm:$0xf]  ;;  %v42_v9 = vld [vmem:[%s925_s0 + $0x4] sm:$0xf] }
  0x22   :  { %v411_v25 = vunpack.c.l.bf16 %v71_v12  ;;  %v494_v27 = vsel %vm379_vm2, %v431_v13, %v422_v17  ;;  %vm383_vm4 = vcmask 1043459   ;;  %v465_v29 = vadd.f32 %v464_v20, %v463_v11  ;;  %v45_v20 = vld [vmem:[%s925_s0 + $0x10] sm:$0xf] }
  0x23   :  { %v457_v28 = vrot.slane %v456_v19, 1  ;;  %v495_v30 = vsel %vm381_vm3, %v440_v18, %v494_v27  ;;  %v449_v32 = vadd.f32 %v448_v22, %v447_v14  ;;  %v472_v33 = vadd.f32 %v471_v23, %v470_v15  ;;  %v46_v18 = vld [vmem:[%s925_s0 + $0x14] sm:$0xf] }
  0x24   :  { %v477_v16 = vsel %vm39_vm0, %v411_v25, 0.0  ;;  %208 = vperm.xlu1 %633, %v768_v26   ;;  %v466_v21 = vrot.slane %v465_v29, 1  ;;  %vm385_vm5 = vcmask 1044484   ;;  %vm387_vm6 = vcmask 1045509  }
  0x25   :  { %196 = vperm.xlu0 %632, %v774_v31   ;;  %v479_v34 = vadd.f32 %v478_v24, %v477_v16  ;;  %v458_v35 = vadd.f32 %v457_v28, %v456_v19  ;;  %v473_v36 = vrot.slane %v472_v33, 2  ;;  %v496_v37 = vsel %vm383_vm4, %v449_v32, %v495_v30 }
  0x26   :  { %v467_v41 = vadd.f32 %v466_v21, %v465_v29  ;;  %vm389_vm7 = vcmask 1046534   ;;  %vm391_vm8 = vcmask 1047559   ;;  %vm689_vm9 = vmmov 0   ;;  %v48_v21 = vld [vmem:[%s925_s0 + $0x1c] sm:$0xf] }
  0x27   :  { %v480_v38 = vrot.slane %v479_v34, 4  ;;  %v474_v39 = vadd.f32 %v473_v36, %v472_v33  ;;  %v497_v43 = vsel %vm385_vm5, %v458_v35, %v496_v37  ;;  %620 = vmatprep.mubr.msk.bf16.mxu0 %vm689_vm9, %v688_v1  ;;  %v690_v57 = vmov 839922192   ;;  %v41_v1 = vld [vmem:[%s925_s0] sm:$0xf] }
  0x28   :  { %232 = vperm.xlu1 %633, %v784_v40   ;;  %v498_v46 = vsel %vm387_vm6, %v467_v41, %v497_v43  ;;  %v80_v58 = vunpack.c.l.s4 %v690_v57  ;;  %v82_v59 = vlaneseq  ;;  %v47_v35 = vld [vmem:[%s925_s0 + $0x18] sm:$0xf]  ;;  %vm592_vm10 = vcmask 257024  }
  0x29   :  { %220 = vperm.xlu0 %632, %v791_v45   ;;  %v481_v42 = vadd.f32 %v480_v38, %v479_v34  ;;  %v475_v26 = vrot.slane %v474_v39, 1  ;;  %v396_v45 = vld [vmem:[#allocation3] sm:$0xff] }
  0x2a   :  { %v81_v60 = vunpack.c.0.s8 %v80_v58  ;;  %v83_v61 = vshrl.u32 %v82_v59, 7 }
  0x2b   :  { %v482_v44 = vrot.slane %v481_v42, 2  ;;  %v476_v31 = vadd.f32 %v475_v26, %v474_v39 }
  0x2c   :  { %256 = vperm.xlu1 %633, %v797_v50   ;;  %v635_v50 = vld [vmem:[#allocation4] sm:$0xff]   ;;  %v827_v62 = vsub.s32 %v81_v60, %v83_v61 }
  0x2d   :  { %v483_v47 = vadd.f32 %v482_v44, %v481_v42  ;;  %244 = vperm.xlu0 %632, %v71_v12   ;;  %v499_v49 = vsel %vm389_vm7, %v476_v31, %v498_v46  ;;  %619 = vmatpush3.bf16.msra.mxu0 %v635_v50 }
  0x2f   :  { %v484_v48 = vrot.slane %v483_v47, 1 }
  0x31   :  { %v485_v40 = vadd.f32 %v484_v48, %v483_v47 }
  0x33   :  { %v500_v51 = vsel %vm391_vm8, %v485_v40, %v499_v49  ;;  %v50_v49 = vld [vmem:[%s925_s0 + $0x24] sm:$0xf] }
  0x34   :  { %v502_v52 = vadd.f32 %v500_v51, %v396_v45  ;;  %v49_v45 = vld [vmem:[%s925_s0 + $0x20] sm:$0xf] }
  0x36   :  { %503 = vst.msk [vmem:[#allocation3] sm:$0xff] %vm39_vm0, %v502_v52 }
  0x3d   :  { %v507_v53 = vld [vmem:[#allocation3] sm:$0xff] }
  0x3e   :  { %v508_v54 = vmax.f32 %v507_v53, 1e-09 }
  0x40   :  { %636 = vrcp.f32 %v508_v54 }
  0x4d   :  { %v637_v56 = vpop.eup %636 }
  0x4e   :  { %513 = vperm.xlu0 %632, %v637_v56  }
  0x8b   :  { %v101_v63 = vpop.permute.xlu1 %100 }
  0x8c   :  { %v77_v0 = vpop.permute.xlu0 %76  ;;  %v109_v3 = vrot.slane %v101_v63, %v827_v62 }
  0x8d   :  { %v85_v4 = vrot.slane %v77_v0, %v827_v62  ;;  %v52_v0 = vld [vmem:[%s925_s0 + $0x2c] sm:$0xf] }
  0x8e   :  { %v268_v5 = vmul.bf16 %v109_v3, %v43_v2  ;;  %v51_v3 = vld [vmem:[%s925_s0 + $0x28] sm:$0xf] }
  0x8f   :  { %v113_v6 = vpop.permute.xlu1 %112  ;;  %v266_v12 = vmul.bf16 %v85_v4, %v41_v1 }
  0x90   :  { %v89_v8 = vpop.permute.xlu0 %88  ;;  %v121_v10 = vrot.slane %v113_v6, %v827_v62  ;;  %v284_v15 = vunpack.c.l.bf16 %v268_v5 }
  0x91   :  { %v97_v11 = vrot.slane %v89_v8, %v827_v62  ;;  %v282_v27 = vunpack.c.l.bf16 %v266_v12 }
  0x92   :  { %v269_v13 = vmul.bf16 %v121_v10, %v44_v7  ;;  %v308_v32 = vsel %vm37_vm1, %v284_v15, 0.0 }
  0x93   :  { %v267_v14 = vmul.bf16 %v97_v11, %v42_v9  ;;  %v137_v17 = vpop.permute.xlu1 %136  ;;  %v299_v41 = vsel %vm37_vm1, %v282_v27, 0.0 }
  0x94   :  { %v125_v19 = vpop.permute.xlu0 %124  ;;  %v285_v22 = vunpack.c.l.bf16 %v269_v13  ;;  %v145_v24 = vrot.slane %v137_v17, %v827_v62  ;;  %v54_v17 = vld [vmem:[%s925_s0 + $0x34] sm:$0xf] }
  0x95   :  { %v283_v23 = vunpack.c.l.bf16 %v267_v14  ;;  %v133_v25 = vrot.slane %v125_v19, %v827_v62 }
  0x96   :  { %v309_v28 = vsel %vm37_vm1, %v285_v22, 0.0  ;;  %v271_v29 = vmul.bf16 %v145_v24, %v46_v18  ;;  %v53_v24 = vld [vmem:[%s925_s0 + $0x30] sm:$0xf] }
  0x97   :  { %v270_v30 = vmul.bf16 %v133_v25, %v45_v20  ;;  %v300_v33 = vsel %vm37_vm1, %v283_v23, 0.0  ;;  %v161_v16 = vpop.permute.xlu1 %160  ;;  %v310_v42 = vadd.f32 %v309_v28, %v308_v32 }
  0x98   :  { %v149_v34 = vpop.permute.xlu0 %148  ;;  %v287_v36 = vunpack.c.l.bf16 %v271_v29  ;;  %v169_v38 = vrot.slane %v161_v16, %v827_v62  ;;  %v301_v46 = vadd.f32 %v300_v33, %v299_v41 }
  0x99   :  { %v286_v37 = vunpack.c.l.bf16 %v270_v30  ;;  %v157_v39 = vrot.slane %v149_v34, %v827_v62  ;;  %v311_v55 = vrot.slane %v310_v42, 4 }
  0x9a   :  { %v318_v43 = vsel %vm37_vm1, %v287_v36, 0.0  ;;  %v273_v44 = vmul.bf16 %v169_v38, %v48_v21  ;;  %v302_v59 = vrot.slane %v301_v46, 4 }
  0x9b   :  { %v317_v26 = vsel %vm37_vm1, %v286_v37, 0.0  ;;  %v272_v31 = vmul.bf16 %v157_v39, %v47_v35  ;;  %v185_v48 = vpop.permute.xlu1 %184  ;;  %v312_v7 = vadd.f32 %v311_v55, %v310_v42  ;;  %v56_v37 = vld [vmem:[%s925_s0 + $0x3c] sm:$0xf]  ;;  %v55_v39 = vld [vmem:[%s925_s0 + $0x38] sm:$0xf] }
  0x9c   :  { %v319_v47 = vadd.f32 %v318_v43, %v317_v26  ;;  %v173_v40 = vpop.permute.xlu0 %172  ;;  %v289_v51 = vunpack.c.l.bf16 %v273_v44  ;;  %v193_v53 = vrot.slane %v185_v48, %v827_v62  ;;  %v303_v13 = vadd.f32 %v302_v59, %v301_v46 }
  0x9d   :  { %v288_v52 = vunpack.c.l.bf16 %v272_v31  ;;  %v181_v54 = vrot.slane %v173_v40, %v827_v62  ;;  %v313_v25 = vrot.slane %v312_v7, 2 }
  0x9e   :  { %v327_v56 = vsel %vm37_vm1, %v289_v51, 0.0  ;;  %v275_v57 = vmul.bf16 %v193_v53, %v50_v49  ;;  %v320_v60 = vrot.slane %v319_v47, 4  ;;  %v304_v16 = vrot.slane %v303_v13, 2 }
  0x9f   :  { %v326_v50 = vsel %vm37_vm1, %v288_v52, 0.0  ;;  %v274_v58 = vmul.bf16 %v181_v54, %v49_v45  ;;  %v209_v63 = vpop.permute.xlu1 %208  ;;  %v314_v45 = vadd.f32 %v313_v25, %v312_v7 }
  0xa0   :  { %v328_v61 = vadd.f32 %v327_v56, %v326_v50  ;;  %v197_v2 = vpop.permute.xlu0 %196  ;;  %v291_v4 = vunpack.c.l.bf16 %v275_v57  ;;  %v217_v5 = vrot.slane %v209_v63, %v827_v62  ;;  %v321_v14 = vadd.f32 %v320_v60, %v319_v47 }
  0xa1   :  { %v290_v1 = vunpack.c.l.bf16 %v274_v58  ;;  %v205_v6 = vrot.slane %v197_v2, %v827_v62  ;;  %v305_v51 = vadd.f32 %v304_v16, %v303_v13  ;;  %v315_v63 = vrot.slane %v314_v45, 1 }
  0xa2   :  { %v329_v8 = vrot.slane %v328_v61, 4  ;;  %v336_v9 = vsel %vm37_vm1, %v291_v4, 0.0  ;;  %v277_v11 = vmul.bf16 %v217_v5, %v52_v0  ;;  %v322_v21 = vrot.slane %v321_v14, 2 }
  0xa3   :  { %v335_v10 = vsel %vm37_vm1, %v290_v1, 0.0  ;;  %v276_v12 = vmul.bf16 %v205_v6, %v51_v3  ;;  %v233_v15 = vpop.permute.xlu1 %232  ;;  %v306_v0 = vrot.slane %v305_v51, 1 }
  0xa4   :  { %v221_v18 = vpop.permute.xlu0 %220  ;;  %v337_v19 = vadd.f32 %v336_v9, %v335_v10  ;;  %v293_v20 = vunpack.c.l.bf16 %v277_v11  ;;  %v241_v23 = vrot.slane %v233_v15, %v827_v62  ;;  %v330_v27 = vadd.f32 %v329_v8, %v328_v61 }
  0xa5   :  { %v292_v22 = vunpack.c.l.bf16 %v276_v12  ;;  %v229_v28 = vrot.slane %v221_v18, %v827_v62  ;;  %v323_v54 = vadd.f32 %v322_v21, %v321_v14  ;;  %v316_v9 = vadd.f32 %v315_v63, %v314_v45 }
  0xa6   :  { %v338_v29 = vrot.slane %v337_v19, 4  ;;  %v345_v30 = vsel %vm37_vm1, %v293_v20, 0.0  ;;  %v279_v33 = vmul.bf16 %v241_v23, %v54_v17  ;;  %v331_v44 = vrot.slane %v330_v27, 2 }
  0xa7   :  { %v344_v32 = vsel %vm37_vm1, %v292_v22, 0.0  ;;  %v278_v35 = vmul.bf16 %v229_v28, %v53_v24  ;;  %v257_v36 = vpop.permute.xlu1 %256  ;;  %v324_v4 = vrot.slane %v323_v54, 1  ;;  %v307_v10 = vadd.f32 %v306_v0, %v305_v51 }
  0xa8   :  { %v346_v34 = vadd.f32 %v345_v30, %v344_v32  ;;  %v245_v38 = vpop.permute.xlu0 %244  ;;  %v339_v41 = vadd.f32 %v338_v29, %v337_v19  ;;  %v295_v42 = vunpack.c.l.bf16 %v279_v33  ;;  %v265_v43 = vrot.slane %v257_v36, %v827_v62  ;;  %v73_v32 = vld [vmem:[#allocation2] sm:$0xff] }
  0xa9   :  { %v253_v26 = vrot.slane %v245_v38, %v827_v62  ;;  %v294_v46 = vunpack.c.l.bf16 %v278_v35  ;;  %v332_v57 = vadd.f32 %v331_v44, %v330_v27  ;;  %v325_v13 = vadd.f32 %v324_v4, %v323_v54 }
  0xaa   :  { %v347_v31 = vrot.slane %v346_v34, 4  ;;  %v340_v47 = vrot.slane %v339_v41, 2  ;;  %v354_v48 = vsel %vm37_vm1, %v295_v42, 0.0  ;;  %v281_v49 = vmul.bf16 %v265_v43, %v56_v37 }
  0xab   :  { %v280_v40 = vmul.bf16 %v253_v26, %v55_v39  ;;  %v353_v53 = vsel %vm37_vm1, %v294_v46, 0.0  ;;  %v333_v5 = vrot.slane %v332_v57, 1  ;;  %v380_v20 = vsel %vm379_vm2, %v316_v9, %v307_v10  ;;  %v609_v39 = vld [vmem:[%s928_s3] ss:$0 sm:$0xff]  ;;  %s660_s3 = scalar_lea.vmem %s601_s5, 64 }
  0xac   :  { %v348_v52 = vadd.f32 %v347_v31, %v346_v34  ;;  %v355_v55 = vadd.f32 %v354_v48, %v353_v53  ;;  %v297_v56 = vunpack.c.l.bf16 %v281_v49  ;;  %v341_v62 = vadd.f32 %v340_v47, %v339_v41  ;;  %p661_p5 = scmp.ne.s32.totalorder %s601_s5, %s660_s3  ;;  %p666_p7 = scmp.lt.s32.totalorder %s660_s3, %s660_s3 }
  0xad   :  { %v296_v50 = vunpack.c.l.bf16 %v280_v40  ;;  %v334_v15 = vadd.f32 %v333_v5, %v332_v57  ;;  %v382_v24 = vsel %vm381_vm3, %v325_v13, %v380_v20 }
  0xae   :  { %v349_v58 = vrot.slane %v348_v52, 2  ;;  %v356_v59 = vrot.slane %v355_v55, 4  ;;  %v363_v60 = vsel %vm37_vm1, %v297_v56, 0.0  ;;  %v342_v7 = vrot.slane %v341_v62, 1  ;;  %p667_p8 = por %p666_p7, %p665_p6 }
  0xaf   :  { %v362_v61 = vsel %vm37_vm1, %v296_v50, 0.0  ;;  %v384_v27 = vsel %vm383_vm4, %v334_v15, %v382_v24 }
  0xb0   :  { %v350_v2 = vadd.f32 %v349_v58, %v348_v52  ;;  %v364_v3 = vadd.f32 %v363_v60, %v362_v61  ;;  %v357_v1 = vadd.f32 %v356_v59, %v355_v55  ;;  %v343_v18 = vadd.f32 %v342_v7, %v341_v62  ;;  %p668_p9 = pnand %p667_p8, %p661_p5 }
  0xb2   :  { %v365_v6 = vrot.slane %v364_v3, 4  ;;  %v358_v8 = vrot.slane %v357_v1, 2  ;;  %v351_v11 = vrot.slane %v350_v2, 1  ;;  %v386_v29 = vsel %vm385_vm5, %v343_v18, %v384_v27 }
  0xb4   :  { %v366_v12 = vadd.f32 %v365_v6, %v364_v3  ;;  %v359_v14 = vadd.f32 %v358_v8, %v357_v1  ;;  %v352_v22 = vadd.f32 %v351_v11, %v350_v2 }
  0xb6   :  { %v367_v17 = vrot.slane %v366_v12, 2  ;;  %v360_v19 = vrot.slane %v359_v14, 1  ;;  %v388_v30 = vsel %vm387_vm6, %v352_v22, %v386_v29 }
  0xb8   :  { %v368_v23 = vadd.f32 %v367_v17, %v366_v12  ;;  %v361_v25 = vadd.f32 %v360_v19, %v359_v14 }
  0xba   :  { %v369_v28 = vrot.slane %v368_v23, 1  ;;  %v390_v16 = vsel %vm389_vm7, %v361_v25, %v388_v30 }
  0xbc   :  { %v370_v33 = vadd.f32 %v369_v28, %v368_v23 }
  0xbe   :  { %v392_v21 = vsel %vm391_vm8, %v370_v33, %v390_v16 }
  0xbf   :  { %v394_v34 = vadd.f32 %v392_v21, %v73_v32 }
  0xc1   :  { %395 = vst.msk [vmem:[#allocation2] sm:$0xff] %vm37_vm1, %v394_v34 }
  0xc8   :  { %v510_v35 = vld [vmem:[#allocation2] sm:$0xff] }
  0xc9   :  { %v514_v36 = vpop.permute.xlu0 %513 }
  0xca   :  { %v516_v37 = vmul.f32 %v514_v36, %v510_v35 }
  0xcc   :  { %v517_v38 = vpack.c.bf16 %v516_v37, %v516_v37 }
  0xce   :  { %621 = vmatmul.mubr.msk.bf16.vlgmr.msra.gmra.mxu0 %vm37_vm1, %v517_v38 }
 0x18e   :  { %v578_v41 = vpop.f32.mrf.mxu0 }
 0x18f   :  { %v579_v42 = vadd.f32 %v609_v39, %v578_v41 }
 0x190   :  { %v622_v43 = vpop.f32.mrf.mxu0 }
 0x191   :  { %v584_v26 = vmul.f32 %v579_v42, %v579_v42 }
 0x192   :  { %v581_v44 = vpop.f32.mrf.mxu0 }
 0x193   :  { %v585_v31 = vsel %vm37_vm1, %v584_v26, 0.0 }
 0x194   :  { %586 = vadd.xlane.f32.xlu1 %v585_v31  ;;  %v623_v46 = vpop.f32.mrf.mxu0 }
 0x21d   :  { %v587_v47 = vpop.xlane.xlu1 %586 }
 0x21e   :  { %v588_v48 = vmax.f32 %v587_v47, 1e-24 }
 0x220   :  { %638 = vrsqrt.f32 %v588_v48 }
 0x22d   :  { %v639_v49 = vpop.eup %638 }
 0x22e   :  { %v590_v40 = vmul.f32 %v639_v49, %v579_v42 }
 0x230   :  { %v591_v45 = vpack.c.bf16 %v590_v40, %v590_v40 }
 0x232   :  { %593 = vst.msk [vmem:[#allocation7] sm:$0xf] %vm592_vm10, %v591_v45 }
 0x233   :  { %671 = shalt.err (!%p668_p9)
}
 0x234   :  { %603 = dma.vmem_to_hbm [thread:$0]  %s601_s5, 64, %s929_s4, [#allocation6]  }
 0x235   :  { %682 = dma.done.wait [#allocation6], 64  }
 0x236   :  { %683 = vsyncadd [#allocation6], 4294967232 }
 0x237   :  { %607 = vsyncpa [#allocation5], 1 }
 0x238   :  { %608 = vsyncpa [#allocation6], 1 }

</bundles_post_ra>
